<compile_context>
chip_gen: v5e
topology: v5e:2x2
jax: 0.10.0
libtpu: 0.0.40
codegen_flags: <defaults>
</compile_context>

<pallas_src>
import functools

import jax
import jax.numpy as jnp
from jax.experimental import pallas as pl
from jax.experimental.pallas import tpu as pltpu


def _round_up(v, m):
    return ((v + m - 1) // m) * m


# ---------------------------------------------------------------------------
# Pallas kernel: fused basis eval + per-component linear layers,
# accumulate-over-k (no Vandermonde materialization, no MXU).
#   x_ref : (gdim, 8, MT8)  VMEM  query points, sublane x lane packed
#   w_ref : (D, K)          SMEM  stacked Linear(K, 1, bias=False) weights
#   o_ref : (D, 8, MT8)     VMEM  output, lane-dense per component
# ---------------------------------------------------------------------------
def _vectornn_kernel(x_ref, w_ref, o_ref, *, D, K):
    x0 = x_ref[0]                        # (8, MT8)
    x1 = x_ref[1]                        # (8, MT8)

    ones = jnp.ones_like(x0)
    x0sq = x0 * x0
    x1sq = x1 * x1
    # The 9 monomials x0^a * x1^b (a, b in {0,1,2}), computed once per tile.
    pow0 = (ones, x0, x0sq)
    pow1 = (ones, x1, x1sq)
    mono = {}
    for a in range(3):
        for b in range(3):
            if a == 0 and b == 0:
                mono[(a, b)] = None          # multiply-by-1 elided
            elif a == 0:
                mono[(a, b)] = pow1[b]
            elif b == 0:
                mono[(a, b)] = pow0[a]
            else:
                mono[(a, b)] = pow0[a] * pow1[b]

    # One EUP cos per point; cos(k*x0) then follows the f32 recurrence
    #   c_k = 2*cos(x0)*c_{k-1} - c_{k-2}   (2 VALU ops per k, hides under slots).
    c1 = jnp.cos(x0)
    two_c1 = c1 + c1

    acc = [None] * D
    cos_km1 = None
    cos_k = ones                             # cos(0 * x0)
    for k in range(K):                       # statically unrolled (K trace-time const)
        if k == 1:
            cos_km1, cos_k = cos_k, c1
        elif k >= 2:
            cos_km1, cos_k = cos_k, two_c1 * cos_k - cos_km1
        m = mono[(k % 3, (k // 3) % 3)]
        phi_k = cos_k if m is None else m * cos_k
        for d in range(D):
            term = w_ref[d, k] * phi_k       # SMEM scalar * vector broadcast (VPU)
            acc[d] = term if acc[d] is None else acc[d] + term

    for d in range(D):
        o_ref[d] = acc[d].astype(o_ref.dtype)


# ---------------------------------------------------------------------------
# Wrapper
# ---------------------------------------------------------------------------
def vectornn_forward(x, weights, *, m_tile=8192):
    """x: (B, N, gdim) f32 points; weights: (D, K) f32  ->  (B, N, D) f32."""
    B, N, gdim = x.shape
    D, K = weights.shape
    assert gdim >= 2, "synthetic basis uses the first two coordinates"

    M = B * N
    # Point-tile selection:
    #  * multiple of 1024 so the (8, m_tile//8) block keeps a 128-multiple lane dim,
    #  * capped near M/2 so the 'parallel' axis has >=2 steps when possible (v7x 2 TCs),
    #  * M padded up to a tile multiple (no divisibility assert).
    m_tile = max(1024, min(m_tile, _round_up(pl.cdiv(M, 2), 1024)))
    m_pad = _round_up(M, m_tile)
    num_tiles = m_pad // m_tile
    mt8 = m_tile // 8

    x_flat = x.reshape(M, gdim).astype(jnp.float32)
    if m_pad != M:
        x_flat = jnp.pad(x_flat, ((0, m_pad - M), (0, 0)))   # zero pad; sliced off below
    # Lane-dense, sublane-packed, tile-contiguous layout: (gdim, tiles, 8, m_tile//8).
    x_blk = x_flat.T.reshape(gdim, num_tiles, 8, mt8)
    w = weights.astype(jnp.float32)

    kernel = functools.partial(_vectornn_kernel, D=D, K=K)

    out_blk = pl.pallas_call(
        kernel,
        out_shape=jax.ShapeDtypeStruct((D, num_tiles, 8, mt8), jnp.float32),
        grid_spec=pl.GridSpec(
            grid=(num_tiles,),
            in_specs=[
                pl.BlockSpec((gdim, None, 8, mt8), lambda i: (0, i, 0, 0)),
                pl.BlockSpec(memory_space=pltpu.MemorySpace.SMEM),   # (D, K) weights
            ],
            out_specs=pl.BlockSpec((D, None, 8, mt8), lambda i: (0, i, 0, 0)),
        ),
        compiler_params=pltpu.CompilerParams(
            dimension_semantics=("parallel",),
        ),
        cost_estimate=pl.CostEstimate(
            flops=int(m_pad) * (K * (3 + 2 * D) + 16),
            transcendentals=int(m_pad),
            bytes_accessed=4 * int(m_pad) * (gdim + D) + 4 * D * K,
        ),
    )(x_blk, w)

    out_t = out_blk.reshape(D, m_pad)[:, :M]                 # (D, M), drop padding
    # TODO(synk): consumers that tolerate (D, B, N) could skip this transpose HBM pass.
    return out_t.T.reshape(B, N, D)


# ---------------------------------------------------------------------------
# Plain-JAX reference (same synthetic basis, torch-forward semantics).
# ---------------------------------------------------------------------------
def _pow012(v, p):
    # Exact small integer powers (p in {0, 1, 2}) without transcendental pow.
    return jnp.where(p == 0.0, 1.0, jnp.where(p == 1.0, v, v * v))


def synthetic_vandermonde_ref(x, K):
    ks = jnp.arange(K, dtype=jnp.int32)
    kf = ks.astype(jnp.float32).reshape(1, 1, K)
    p0 = (ks % 3).astype(jnp.float32).reshape(1, 1, K)
    p1 = ((ks // 3) % 3).astype(jnp.float32).reshape(1, 1, K)
    x0 = x[..., 0:1]
    x1 = x[..., 1:2]
    return _pow012(x0, p0) * _pow012(x1, p1) * jnp.cos(kf * x0)    # (B, N, K)


if __name__ == "__main__":
    # Small shapes consistent with the module:
    #   value components D = 2, ndofs per component K = 32,
    #   batch B = 2, points per batch N = 128, geometric dim = 2.
    B, N, gdim = 2, 128, 2
    D, K = 2, 32

    key = jax.random.PRNGKey(0)
    kx, kw = jax.random.split(key)

    x = jax.random.uniform(kx, (B, N, gdim), dtype=jnp.float32)        # query points
    weights = jax.random.normal(kw, (D, K), dtype=jnp.float32) * 0.1   # stacked lin_d.weight[0]

    out = vectornn_forward(x, weights)                                  # (B, N, D)
    out = jax.block_until_ready(out)

    vand = synthetic_vandermonde_ref(x, K)                              # (B, N, K)
    ref = jnp.einsum("bnk,dk->bnd", vand, weights)

    assert out.shape == (B, N, D)
    assert jnp.allclose(out, ref, atol=1e-4, rtol=1e-4), float(jnp.max(jnp.abs(out - ref)))

    print("KERNEL_OK")
</pallas_src>

<mosaic_0001>
module attributes {stable_mosaic.version = 11 : i64} {
  func.func @_vectornn_kernel(%arg0: i32, %arg1: memref<2x1x8x128xf32, #tpu.memory_space<vmem>>, %arg2: memref<2x32xf32, #tpu.memory_space<smem>>, %arg3: memref<2x1x8x128xf32, #tpu.memory_space<vmem>>) attributes {dimension_semantics = [#tpu.dimension_semantics<parallel>], iteration_bounds = array<i64: 1>, scalar_prefetch = 0 : i64, scratch_operands = 0 : i64, tpu.core_type = #tpu.core_type<tc>, window_params = [{transform_indices = @transform_0, window_bounds = array<i64: 2, 1, 8, 128>}, {transform_indices = @transform_1, window_bounds = array<i64: 2, 32>}, {transform_indices = @transform_2, window_bounds = array<i64: 2, 1, 8, 128>}]} {
    %c0 = arith.constant 0 : index
    %c0_0 = arith.constant 0 : index
    %c0_1 = arith.constant 0 : index
    %c0_2 = arith.constant 0 : index
    %0 = vector.load %arg1[%c0, %c0_0, %c0_1, %c0_2] : memref<2x1x8x128xf32, #tpu.memory_space<vmem>>, vector<1x1x8x128xf32>
    %1 = vector.shape_cast %0 : vector<1x1x8x128xf32> to vector<8x128xf32>
    %c1 = arith.constant 1 : index
    %c0_3 = arith.constant 0 : index
    %c0_4 = arith.constant 0 : index
    %c0_5 = arith.constant 0 : index
    %2 = vector.load %arg1[%c1, %c0_3, %c0_4, %c0_5] : memref<2x1x8x128xf32, #tpu.memory_space<vmem>>, vector<1x1x8x128xf32>
    %3 = vector.shape_cast %2 : vector<1x1x8x128xf32> to vector<8x128xf32>
    %cst = arith.constant 1.000000e+00 : f32
    %4 = vector.broadcast %cst : f32 to vector<8x128xf32>
    %5 = arith.mulf %1, %1 : vector<8x128xf32>
    %6 = arith.mulf %3, %3 : vector<8x128xf32>
    %7 = arith.mulf %1, %3 : vector<8x128xf32>
    %8 = arith.mulf %1, %6 : vector<8x128xf32>
    %9 = arith.mulf %5, %3 : vector<8x128xf32>
    %10 = arith.mulf %5, %6 : vector<8x128xf32>
    %11 = math.cos %1 : vector<8x128xf32>
    %12 = arith.addf %11, %11 : vector<8x128xf32>
    %c0_6 = arith.constant 0 : index
    %c0_7 = arith.constant 0 : index
    %13 = memref.load %arg2[%c0_6, %c0_7] : memref<2x32xf32, #tpu.memory_space<smem>>
    %14 = vector.broadcast %13 : f32 to vector<8x128xf32>
    %15 = arith.mulf %14, %4 : vector<8x128xf32>
    %c1_8 = arith.constant 1 : index
    %c0_9 = arith.constant 0 : index
    %16 = memref.load %arg2[%c1_8, %c0_9] : memref<2x32xf32, #tpu.memory_space<smem>>
    %17 = vector.broadcast %16 : f32 to vector<8x128xf32>
    %18 = arith.mulf %17, %4 : vector<8x128xf32>
    %19 = arith.mulf %1, %11 : vector<8x128xf32>
    %c0_10 = arith.constant 0 : index
    %c1_11 = arith.constant 1 : index
    %20 = memref.load %arg2[%c0_10, %c1_11] : memref<2x32xf32, #tpu.memory_space<smem>>
    %21 = vector.broadcast %20 : f32 to vector<8x128xf32>
    %22 = arith.mulf %21, %19 : vector<8x128xf32>
    %23 = arith.addf %15, %22 : vector<8x128xf32>
    %c1_12 = arith.constant 1 : index
    %c1_13 = arith.constant 1 : index
    %24 = memref.load %arg2[%c1_12, %c1_13] : memref<2x32xf32, #tpu.memory_space<smem>>
    %25 = vector.broadcast %24 : f32 to vector<8x128xf32>
    %26 = arith.mulf %25, %19 : vector<8x128xf32>
    %27 = arith.addf %18, %26 : vector<8x128xf32>
    %28 = arith.mulf %12, %11 : vector<8x128xf32>
    %29 = arith.subf %28, %4 : vector<8x128xf32>
    %30 = arith.mulf %5, %29 : vector<8x128xf32>
    %c0_14 = arith.constant 0 : index
    %c2 = arith.constant 2 : index
    %31 = memref.load %arg2[%c0_14, %c2] : memref<2x32xf32, #tpu.memory_space<smem>>
    %32 = vector.broadcast %31 : f32 to vector<8x128xf32>
    %33 = arith.mulf %32, %30 : vector<8x128xf32>
    %34 = arith.addf %23, %33 : vector<8x128xf32>
    %c1_15 = arith.constant 1 : index
    %c2_16 = arith.constant 2 : index
    %35 = memref.load %arg2[%c1_15, %c2_16] : memref<2x32xf32, #tpu.memory_space<smem>>
    %36 = vector.broadcast %35 : f32 to vector<8x128xf32>
    %37 = arith.mulf %36, %30 : vector<8x128xf32>
    %38 = arith.addf %27, %37 : vector<8x128xf32>
    %39 = arith.mulf %12, %29 : vector<8x128xf32>
    %40 = arith.subf %39, %11 : vector<8x128xf32>
    %41 = arith.mulf %3, %40 : vector<8x128xf32>
    %c0_17 = arith.constant 0 : index
    %c3 = arith.constant 3 : index
    %42 = memref.load %arg2[%c0_17, %c3] : memref<2x32xf32, #tpu.memory_space<smem>>
    %43 = vector.broadcast %42 : f32 to vector<8x128xf32>
    %44 = arith.mulf %43, %41 : vector<8x128xf32>
    %45 = arith.addf %34, %44 : vector<8x128xf32>
    %c1_18 = arith.constant 1 : index
    %c3_19 = arith.constant 3 : index
    %46 = memref.load %arg2[%c1_18, %c3_19] : memref<2x32xf32, #tpu.memory_space<smem>>
    %47 = vector.broadcast %46 : f32 to vector<8x128xf32>
    %48 = arith.mulf %47, %41 : vector<8x128xf32>
    %49 = arith.addf %38, %48 : vector<8x128xf32>
    %50 = arith.mulf %12, %40 : vector<8x128xf32>
    %51 = arith.subf %50, %29 : vector<8x128xf32>
    %52 = arith.mulf %7, %51 : vector<8x128xf32>
    %c0_20 = arith.constant 0 : index
    %c4 = arith.constant 4 : index
    %53 = memref.load %arg2[%c0_20, %c4] : memref<2x32xf32, #tpu.memory_space<smem>>
    %54 = vector.broadcast %53 : f32 to vector<8x128xf32>
    %55 = arith.mulf %54, %52 : vector<8x128xf32>
    %56 = arith.addf %45, %55 : vector<8x128xf32>
    %c1_21 = arith.constant 1 : index
    %c4_22 = arith.constant 4 : index
    %57 = memref.load %arg2[%c1_21, %c4_22] : memref<2x32xf32, #tpu.memory_space<smem>>
    %58 = vector.broadcast %57 : f32 to vector<8x128xf32>
    %59 = arith.mulf %58, %52 : vector<8x128xf32>
    %60 = arith.addf %49, %59 : vector<8x128xf32>
    %61 = arith.mulf %12, %51 : vector<8x128xf32>
    %62 = arith.subf %61, %40 : vector<8x128xf32>
    %63 = arith.mulf %9, %62 : vector<8x128xf32>
    %c0_23 = arith.constant 0 : index
    %c5 = arith.constant 5 : index
    %64 = memref.load %arg2[%c0_23, %c5] : memref<2x32xf32, #tpu.memory_space<smem>>
    %65 = vector.broadcast %64 : f32 to vector<8x128xf32>
    %66 = arith.mulf %65, %63 : vector<8x128xf32>
    %67 = arith.addf %56, %66 : vector<8x128xf32>
    %c1_24 = arith.constant 1 : index
    %c5_25 = arith.constant 5 : index
    %68 = memref.load %arg2[%c1_24, %c5_25] : memref<2x32xf32, #tpu.memory_space<smem>>
    %69 = vector.broadcast %68 : f32 to vector<8x128xf32>
    %70 = arith.mulf %69, %63 : vector<8x128xf32>
    %71 = arith.addf %60, %70 : vector<8x128xf32>
    %72 = arith.mulf %12, %62 : vector<8x128xf32>
    %73 = arith.subf %72, %51 : vector<8x128xf32>
    %74 = arith.mulf %6, %73 : vector<8x128xf32>
    %c0_26 = arith.constant 0 : index
    %c6 = arith.constant 6 : index
    %75 = memref.load %arg2[%c0_26, %c6] : memref<2x32xf32, #tpu.memory_space<smem>>
    %76 = vector.broadcast %75 : f32 to vector<8x128xf32>
    %77 = arith.mulf %76, %74 : vector<8x128xf32>
    %78 = arith.addf %67, %77 : vector<8x128xf32>
    %c1_27 = arith.constant 1 : index
    %c6_28 = arith.constant 6 : index
    %79 = memref.load %arg2[%c1_27, %c6_28] : memref<2x32xf32, #tpu.memory_space<smem>>
    %80 = vector.broadcast %79 : f32 to vector<8x128xf32>
    %81 = arith.mulf %80, %74 : vector<8x128xf32>
    %82 = arith.addf %71, %81 : vector<8x128xf32>
    %83 = arith.mulf %12, %73 : vector<8x128xf32>
    %84 = arith.subf %83, %62 : vector<8x128xf32>
    %85 = arith.mulf %8, %84 : vector<8x128xf32>
    %c0_29 = arith.constant 0 : index
    %c7 = arith.constant 7 : index
    %86 = memref.load %arg2[%c0_29, %c7] : memref<2x32xf32, #tpu.memory_space<smem>>
    %87 = vector.broadcast %86 : f32 to vector<8x128xf32>
    %88 = arith.mulf %87, %85 : vector<8x128xf32>
    %89 = arith.addf %78, %88 : vector<8x128xf32>
    %c1_30 = arith.constant 1 : index
    %c7_31 = arith.constant 7 : index
    %90 = memref.load %arg2[%c1_30, %c7_31] : memref<2x32xf32, #tpu.memory_space<smem>>
    %91 = vector.broadcast %90 : f32 to vector<8x128xf32>
    %92 = arith.mulf %91, %85 : vector<8x128xf32>
    %93 = arith.addf %82, %92 : vector<8x128xf32>
    %94 = arith.mulf %12, %84 : vector<8x128xf32>
    %95 = arith.subf %94, %73 : vector<8x128xf32>
    %96 = arith.mulf %10, %95 : vector<8x128xf32>
    %c0_32 = arith.constant 0 : index
    %c8 = arith.constant 8 : index
    %97 = memref.load %arg2[%c0_32, %c8] : memref<2x32xf32, #tpu.memory_space<smem>>
    %98 = vector.broadcast %97 : f32 to vector<8x128xf32>
    %99 = arith.mulf %98, %96 : vector<8x128xf32>
    %100 = arith.addf %89, %99 : vector<8x128xf32>
    %c1_33 = arith.constant 1 : index
    %c8_34 = arith.constant 8 : index
    %101 = memref.load %arg2[%c1_33, %c8_34] : memref<2x32xf32, #tpu.memory_space<smem>>
    %102 = vector.broadcast %101 : f32 to vector<8x128xf32>
    %103 = arith.mulf %102, %96 : vector<8x128xf32>
    %104 = arith.addf %93, %103 : vector<8x128xf32>
    %105 = arith.mulf %12, %95 : vector<8x128xf32>
    %106 = arith.subf %105, %84 : vector<8x128xf32>
    %c0_35 = arith.constant 0 : index
    %c9 = arith.constant 9 : index
    %107 = memref.load %arg2[%c0_35, %c9] : memref<2x32xf32, #tpu.memory_space<smem>>
    %108 = vector.broadcast %107 : f32 to vector<8x128xf32>
    %109 = arith.mulf %108, %106 : vector<8x128xf32>
    %110 = arith.addf %100, %109 : vector<8x128xf32>
    %c1_36 = arith.constant 1 : index
    %c9_37 = arith.constant 9 : index
    %111 = memref.load %arg2[%c1_36, %c9_37] : memref<2x32xf32, #tpu.memory_space<smem>>
    %112 = vector.broadcast %111 : f32 to vector<8x128xf32>
    %113 = arith.mulf %112, %106 : vector<8x128xf32>
    %114 = arith.addf %104, %113 : vector<8x128xf32>
    %115 = arith.mulf %12, %106 : vector<8x128xf32>
    %116 = arith.subf %115, %95 : vector<8x128xf32>
    %117 = arith.mulf %1, %116 : vector<8x128xf32>
    %c0_38 = arith.constant 0 : index
    %c10 = arith.constant 10 : index
    %118 = memref.load %arg2[%c0_38, %c10] : memref<2x32xf32, #tpu.memory_space<smem>>
    %119 = vector.broadcast %118 : f32 to vector<8x128xf32>
    %120 = arith.mulf %119, %117 : vector<8x128xf32>
    %121 = arith.addf %110, %120 : vector<8x128xf32>
    %c1_39 = arith.constant 1 : index
    %c10_40 = arith.constant 10 : index
    %122 = memref.load %arg2[%c1_39, %c10_40] : memref<2x32xf32, #tpu.memory_space<smem>>
    %123 = vector.broadcast %122 : f32 to vector<8x128xf32>
    %124 = arith.mulf %123, %117 : vector<8x128xf32>
    %125 = arith.addf %114, %124 : vector<8x128xf32>
    %126 = arith.mulf %12, %116 : vector<8x128xf32>
    %127 = arith.subf %126, %106 : vector<8x128xf32>
    %128 = arith.mulf %5, %127 : vector<8x128xf32>
    %c0_41 = arith.constant 0 : index
    %c11 = arith.constant 11 : index
    %129 = memref.load %arg2[%c0_41, %c11] : memref<2x32xf32, #tpu.memory_space<smem>>
    %130 = vector.broadcast %129 : f32 to vector<8x128xf32>
    %131 = arith.mulf %130, %128 : vector<8x128xf32>
    %132 = arith.addf %121, %131 : vector<8x128xf32>
    %c1_42 = arith.constant 1 : index
    %c11_43 = arith.constant 11 : index
    %133 = memref.load %arg2[%c1_42, %c11_43] : memref<2x32xf32, #tpu.memory_space<smem>>
    %134 = vector.broadcast %133 : f32 to vector<8x128xf32>
    %135 = arith.mulf %134, %128 : vector<8x128xf32>
    %136 = arith.addf %125, %135 : vector<8x128xf32>
    %137 = arith.mulf %12, %127 : vector<8x128xf32>
    %138 = arith.subf %137, %116 : vector<8x128xf32>
    %139 = arith.mulf %3, %138 : vector<8x128xf32>
    %c0_44 = arith.constant 0 : index
    %c12 = arith.constant 12 : index
    %140 = memref.load %arg2[%c0_44, %c12] : memref<2x32xf32, #tpu.memory_space<smem>>
    %141 = vector.broadcast %140 : f32 to vector<8x128xf32>
    %142 = arith.mulf %141, %139 : vector<8x128xf32>
    %143 = arith.addf %132, %142 : vector<8x128xf32>
    %c1_45 = arith.constant 1 : index
    %c12_46 = arith.constant 12 : index
    %144 = memref.load %arg2[%c1_45, %c12_46] : memref<2x32xf32, #tpu.memory_space<smem>>
    %145 = vector.broadcast %144 : f32 to vector<8x128xf32>
    %146 = arith.mulf %145, %139 : vector<8x128xf32>
    %147 = arith.addf %136, %146 : vector<8x128xf32>
    %148 = arith.mulf %12, %138 : vector<8x128xf32>
    %149 = arith.subf %148, %127 : vector<8x128xf32>
    %150 = arith.mulf %7, %149 : vector<8x128xf32>
    %c0_47 = arith.constant 0 : index
    %c13 = arith.constant 13 : index
    %151 = memref.load %arg2[%c0_47, %c13] : memref<2x32xf32, #tpu.memory_space<smem>>
    %152 = vector.broadcast %151 : f32 to vector<8x128xf32>
    %153 = arith.mulf %152, %150 : vector<8x128xf32>
    %154 = arith.addf %143, %153 : vector<8x128xf32>
    %c1_48 = arith.constant 1 : index
    %c13_49 = arith.constant 13 : index
    %155 = memref.load %arg2[%c1_48, %c13_49] : memref<2x32xf32, #tpu.memory_space<smem>>
    %156 = vector.broadcast %155 : f32 to vector<8x128xf32>
    %157 = arith.mulf %156, %150 : vector<8x128xf32>
    %158 = arith.addf %147, %157 : vector<8x128xf32>
    %159 = arith.mulf %12, %149 : vector<8x128xf32>
    %160 = arith.subf %159, %138 : vector<8x128xf32>
    %161 = arith.mulf %9, %160 : vector<8x128xf32>
    %c0_50 = arith.constant 0 : index
    %c14 = arith.constant 14 : index
    %162 = memref.load %arg2[%c0_50, %c14] : memref<2x32xf32, #tpu.memory_space<smem>>
    %163 = vector.broadcast %162 : f32 to vector<8x128xf32>
    %164 = arith.mulf %163, %161 : vector<8x128xf32>
    %165 = arith.addf %154, %164 : vector<8x128xf32>
    %c1_51 = arith.constant 1 : index
    %c14_52 = arith.constant 14 : index
    %166 = memref.load %arg2[%c1_51, %c14_52] : memref<2x32xf32, #tpu.memory_space<smem>>
    %167 = vector.broadcast %166 : f32 to vector<8x128xf32>
    %168 = arith.mulf %167, %161 : vector<8x128xf32>
    %169 = arith.addf %158, %168 : vector<8x128xf32>
    %170 = arith.mulf %12, %160 : vector<8x128xf32>
    %171 = arith.subf %170, %149 : vector<8x128xf32>
    %172 = arith.mulf %6, %171 : vector<8x128xf32>
    %c0_53 = arith.constant 0 : index
    %c15 = arith.constant 15 : index
    %173 = memref.load %arg2[%c0_53, %c15] : memref<2x32xf32, #tpu.memory_space<smem>>
    %174 = vector.broadcast %173 : f32 to vector<8x128xf32>
    %175 = arith.mulf %174, %172 : vector<8x128xf32>
    %176 = arith.addf %165, %175 : vector<8x128xf32>
    %c1_54 = arith.constant 1 : index
    %c15_55 = arith.constant 15 : index
    %177 = memref.load %arg2[%c1_54, %c15_55] : memref<2x32xf32, #tpu.memory_space<smem>>
    %178 = vector.broadcast %177 : f32 to vector<8x128xf32>
    %179 = arith.mulf %178, %172 : vector<8x128xf32>
    %180 = arith.addf %169, %179 : vector<8x128xf32>
    %181 = arith.mulf %12, %171 : vector<8x128xf32>
    %182 = arith.subf %181, %160 : vector<8x128xf32>
    %183 = arith.mulf %8, %182 : vector<8x128xf32>
    %c0_56 = arith.constant 0 : index
    %c16 = arith.constant 16 : index
    %184 = memref.load %arg2[%c0_56, %c16] : memref<2x32xf32, #tpu.memory_space<smem>>
    %185 = vector.broadcast %184 : f32 to vector<8x128xf32>
    %186 = arith.mulf %185, %183 : vector<8x128xf32>
    %187 = arith.addf %176, %186 : vector<8x128xf32>
    %c1_57 = arith.constant 1 : index
    %c16_58 = arith.constant 16 : index
    %188 = memref.load %arg2[%c1_57, %c16_58] : memref<2x32xf32, #tpu.memory_space<smem>>
    %189 = vector.broadcast %188 : f32 to vector<8x128xf32>
    %190 = arith.mulf %189, %183 : vector<8x128xf32>
    %191 = arith.addf %180, %190 : vector<8x128xf32>
    %192 = arith.mulf %12, %182 : vector<8x128xf32>
    %193 = arith.subf %192, %171 : vector<8x128xf32>
    %194 = arith.mulf %10, %193 : vector<8x128xf32>
    %c0_59 = arith.constant 0 : index
    %c17 = arith.constant 17 : index
    %195 = memref.load %arg2[%c0_59, %c17] : memref<2x32xf32, #tpu.memory_space<smem>>
    %196 = vector.broadcast %195 : f32 to vector<8x128xf32>
    %197 = arith.mulf %196, %194 : vector<8x128xf32>
    %198 = arith.addf %187, %197 : vector<8x128xf32>
    %c1_60 = arith.constant 1 : index
    %c17_61 = arith.constant 17 : index
    %199 = memref.load %arg2[%c1_60, %c17_61] : memref<2x32xf32, #tpu.memory_space<smem>>
    %200 = vector.broadcast %199 : f32 to vector<8x128xf32>
    %201 = arith.mulf %200, %194 : vector<8x128xf32>
    %202 = arith.addf %191, %201 : vector<8x128xf32>
    %203 = arith.mulf %12, %193 : vector<8x128xf32>
    %204 = arith.subf %203, %182 : vector<8x128xf32>
    %c0_62 = arith.constant 0 : index
    %c18 = arith.constant 18 : index
    %205 = memref.load %arg2[%c0_62, %c18] : memref<2x32xf32, #tpu.memory_space<smem>>
    %206 = vector.broadcast %205 : f32 to vector<8x128xf32>
    %207 = arith.mulf %206, %204 : vector<8x128xf32>
    %208 = arith.addf %198, %207 : vector<8x128xf32>
    %c1_63 = arith.constant 1 : index
    %c18_64 = arith.constant 18 : index
    %209 = memref.load %arg2[%c1_63, %c18_64] : memref<2x32xf32, #tpu.memory_space<smem>>
    %210 = vector.broadcast %209 : f32 to vector<8x128xf32>
    %211 = arith.mulf %210, %204 : vector<8x128xf32>
    %212 = arith.addf %202, %211 : vector<8x128xf32>
    %213 = arith.mulf %12, %204 : vector<8x128xf32>
    %214 = arith.subf %213, %193 : vector<8x128xf32>
    %215 = arith.mulf %1, %214 : vector<8x128xf32>
    %c0_65 = arith.constant 0 : index
    %c19 = arith.constant 19 : index
    %216 = memref.load %arg2[%c0_65, %c19] : memref<2x32xf32, #tpu.memory_space<smem>>
    %217 = vector.broadcast %216 : f32 to vector<8x128xf32>
    %218 = arith.mulf %217, %215 : vector<8x128xf32>
    %219 = arith.addf %208, %218 : vector<8x128xf32>
    %c1_66 = arith.constant 1 : index
    %c19_67 = arith.constant 19 : index
    %220 = memref.load %arg2[%c1_66, %c19_67] : memref<2x32xf32, #tpu.memory_space<smem>>
    %221 = vector.broadcast %220 : f32 to vector<8x128xf32>
    %222 = arith.mulf %221, %215 : vector<8x128xf32>
    %223 = arith.addf %212, %222 : vector<8x128xf32>
    %224 = arith.mulf %12, %214 : vector<8x128xf32>
    %225 = arith.subf %224, %204 : vector<8x128xf32>
    %226 = arith.mulf %5, %225 : vector<8x128xf32>
    %c0_68 = arith.constant 0 : index
    %c20 = arith.constant 20 : index
    %227 = memref.load %arg2[%c0_68, %c20] : memref<2x32xf32, #tpu.memory_space<smem>>
    %228 = vector.broadcast %227 : f32 to vector<8x128xf32>
    %229 = arith.mulf %228, %226 : vector<8x128xf32>
    %230 = arith.addf %219, %229 : vector<8x128xf32>
    %c1_69 = arith.constant 1 : index
    %c20_70 = arith.constant 20 : index
    %231 = memref.load %arg2[%c1_69, %c20_70] : memref<2x32xf32, #tpu.memory_space<smem>>
    %232 = vector.broadcast %231 : f32 to vector<8x128xf32>
    %233 = arith.mulf %232, %226 : vector<8x128xf32>
    %234 = arith.addf %223, %233 : vector<8x128xf32>
    %235 = arith.mulf %12, %225 : vector<8x128xf32>
    %236 = arith.subf %235, %214 : vector<8x128xf32>
    %237 = arith.mulf %3, %236 : vector<8x128xf32>
    %c0_71 = arith.constant 0 : index
    %c21 = arith.constant 21 : index
    %238 = memref.load %arg2[%c0_71, %c21] : memref<2x32xf32, #tpu.memory_space<smem>>
    %239 = vector.broadcast %238 : f32 to vector<8x128xf32>
    %240 = arith.mulf %239, %237 : vector<8x128xf32>
    %241 = arith.addf %230, %240 : vector<8x128xf32>
    %c1_72 = arith.constant 1 : index
    %c21_73 = arith.constant 21 : index
    %242 = memref.load %arg2[%c1_72, %c21_73] : memref<2x32xf32, #tpu.memory_space<smem>>
    %243 = vector.broadcast %242 : f32 to vector<8x128xf32>
    %244 = arith.mulf %243, %237 : vector<8x128xf32>
    %245 = arith.addf %234, %244 : vector<8x128xf32>
    %246 = arith.mulf %12, %236 : vector<8x128xf32>
    %247 = arith.subf %246, %225 : vector<8x128xf32>
    %248 = arith.mulf %7, %247 : vector<8x128xf32>
    %c0_74 = arith.constant 0 : index
    %c22 = arith.constant 22 : index
    %249 = memref.load %arg2[%c0_74, %c22] : memref<2x32xf32, #tpu.memory_space<smem>>
    %250 = vector.broadcast %249 : f32 to vector<8x128xf32>
    %251 = arith.mulf %250, %248 : vector<8x128xf32>
    %252 = arith.addf %241, %251 : vector<8x128xf32>
    %c1_75 = arith.constant 1 : index
    %c22_76 = arith.constant 22 : index
    %253 = memref.load %arg2[%c1_75, %c22_76] : memref<2x32xf32, #tpu.memory_space<smem>>
    %254 = vector.broadcast %253 : f32 to vector<8x128xf32>
    %255 = arith.mulf %254, %248 : vector<8x128xf32>
    %256 = arith.addf %245, %255 : vector<8x128xf32>
    %257 = arith.mulf %12, %247 : vector<8x128xf32>
    %258 = arith.subf %257, %236 : vector<8x128xf32>
    %259 = arith.mulf %9, %258 : vector<8x128xf32>
    %c0_77 = arith.constant 0 : index
    %c23 = arith.constant 23 : index
    %260 = memref.load %arg2[%c0_77, %c23] : memref<2x32xf32, #tpu.memory_space<smem>>
    %261 = vector.broadcast %260 : f32 to vector<8x128xf32>
    %262 = arith.mulf %261, %259 : vector<8x128xf32>
    %263 = arith.addf %252, %262 : vector<8x128xf32>
    %c1_78 = arith.constant 1 : index
    %c23_79 = arith.constant 23 : index
    %264 = memref.load %arg2[%c1_78, %c23_79] : memref<2x32xf32, #tpu.memory_space<smem>>
    %265 = vector.broadcast %264 : f32 to vector<8x128xf32>
    %266 = arith.mulf %265, %259 : vector<8x128xf32>
    %267 = arith.addf %256, %266 : vector<8x128xf32>
    %268 = arith.mulf %12, %258 : vector<8x128xf32>
    %269 = arith.subf %268, %247 : vector<8x128xf32>
    %270 = arith.mulf %6, %269 : vector<8x128xf32>
    %c0_80 = arith.constant 0 : index
    %c24 = arith.constant 24 : index
    %271 = memref.load %arg2[%c0_80, %c24] : memref<2x32xf32, #tpu.memory_space<smem>>
    %272 = vector.broadcast %271 : f32 to vector<8x128xf32>
    %273 = arith.mulf %272, %270 : vector<8x128xf32>
    %274 = arith.addf %263, %273 : vector<8x128xf32>
    %c1_81 = arith.constant 1 : index
    %c24_82 = arith.constant 24 : index
    %275 = memref.load %arg2[%c1_81, %c24_82] : memref<2x32xf32, #tpu.memory_space<smem>>
    %276 = vector.broadcast %275 : f32 to vector<8x128xf32>
    %277 = arith.mulf %276, %270 : vector<8x128xf32>
    %278 = arith.addf %267, %277 : vector<8x128xf32>
    %279 = arith.mulf %12, %269 : vector<8x128xf32>
    %280 = arith.subf %279, %258 : vector<8x128xf32>
    %281 = arith.mulf %8, %280 : vector<8x128xf32>
    %c0_83 = arith.constant 0 : index
    %c25 = arith.constant 25 : index
    %282 = memref.load %arg2[%c0_83, %c25] : memref<2x32xf32, #tpu.memory_space<smem>>
    %283 = vector.broadcast %282 : f32 to vector<8x128xf32>
    %284 = arith.mulf %283, %281 : vector<8x128xf32>
    %285 = arith.addf %274, %284 : vector<8x128xf32>
    %c1_84 = arith.constant 1 : index
    %c25_85 = arith.constant 25 : index
    %286 = memref.load %arg2[%c1_84, %c25_85] : memref<2x32xf32, #tpu.memory_space<smem>>
    %287 = vector.broadcast %286 : f32 to vector<8x128xf32>
    %288 = arith.mulf %287, %281 : vector<8x128xf32>
    %289 = arith.addf %278, %288 : vector<8x128xf32>
    %290 = arith.mulf %12, %280 : vector<8x128xf32>
    %291 = arith.subf %290, %269 : vector<8x128xf32>
    %292 = arith.mulf %10, %291 : vector<8x128xf32>
    %c0_86 = arith.constant 0 : index
    %c26 = arith.constant 26 : index
    %293 = memref.load %arg2[%c0_86, %c26] : memref<2x32xf32, #tpu.memory_space<smem>>
    %294 = vector.broadcast %293 : f32 to vector<8x128xf32>
    %295 = arith.mulf %294, %292 : vector<8x128xf32>
    %296 = arith.addf %285, %295 : vector<8x128xf32>
    %c1_87 = arith.constant 1 : index
    %c26_88 = arith.constant 26 : index
    %297 = memref.load %arg2[%c1_87, %c26_88] : memref<2x32xf32, #tpu.memory_space<smem>>
    %298 = vector.broadcast %297 : f32 to vector<8x128xf32>
    %299 = arith.mulf %298, %292 : vector<8x128xf32>
    %300 = arith.addf %289, %299 : vector<8x128xf32>
    %301 = arith.mulf %12, %291 : vector<8x128xf32>
    %302 = arith.subf %301, %280 : vector<8x128xf32>
    %c0_89 = arith.constant 0 : index
    %c27 = arith.constant 27 : index
    %303 = memref.load %arg2[%c0_89, %c27] : memref<2x32xf32, #tpu.memory_space<smem>>
    %304 = vector.broadcast %303 : f32 to vector<8x128xf32>
    %305 = arith.mulf %304, %302 : vector<8x128xf32>
    %306 = arith.addf %296, %305 : vector<8x128xf32>
    %c1_90 = arith.constant 1 : index
    %c27_91 = arith.constant 27 : index
    %307 = memref.load %arg2[%c1_90, %c27_91] : memref<2x32xf32, #tpu.memory_space<smem>>
    %308 = vector.broadcast %307 : f32 to vector<8x128xf32>
    %309 = arith.mulf %308, %302 : vector<8x128xf32>
    %310 = arith.addf %300, %309 : vector<8x128xf32>
    %311 = arith.mulf %12, %302 : vector<8x128xf32>
    %312 = arith.subf %311, %291 : vector<8x128xf32>
    %313 = arith.mulf %1, %312 : vector<8x128xf32>
    %c0_92 = arith.constant 0 : index
    %c28 = arith.constant 28 : index
    %314 = memref.load %arg2[%c0_92, %c28] : memref<2x32xf32, #tpu.memory_space<smem>>
    %315 = vector.broadcast %314 : f32 to vector<8x128xf32>
    %316 = arith.mulf %315, %313 : vector<8x128xf32>
    %317 = arith.addf %306, %316 : vector<8x128xf32>
    %c1_93 = arith.constant 1 : index
    %c28_94 = arith.constant 28 : index
    %318 = memref.load %arg2[%c1_93, %c28_94] : memref<2x32xf32, #tpu.memory_space<smem>>
    %319 = vector.broadcast %318 : f32 to vector<8x128xf32>
    %320 = arith.mulf %319, %313 : vector<8x128xf32>
    %321 = arith.addf %310, %320 : vector<8x128xf32>
    %322 = arith.mulf %12, %312 : vector<8x128xf32>
    %323 = arith.subf %322, %302 : vector<8x128xf32>
    %324 = arith.mulf %5, %323 : vector<8x128xf32>
    %c0_95 = arith.constant 0 : index
    %c29 = arith.constant 29 : index
    %325 = memref.load %arg2[%c0_95, %c29] : memref<2x32xf32, #tpu.memory_space<smem>>
    %326 = vector.broadcast %325 : f32 to vector<8x128xf32>
    %327 = arith.mulf %326, %324 : vector<8x128xf32>
    %328 = arith.addf %317, %327 : vector<8x128xf32>
    %c1_96 = arith.constant 1 : index
    %c29_97 = arith.constant 29 : index
    %329 = memref.load %arg2[%c1_96, %c29_97] : memref<2x32xf32, #tpu.memory_space<smem>>
    %330 = vector.broadcast %329 : f32 to vector<8x128xf32>
    %331 = arith.mulf %330, %324 : vector<8x128xf32>
    %332 = arith.addf %321, %331 : vector<8x128xf32>
    %333 = arith.mulf %12, %323 : vector<8x128xf32>
    %334 = arith.subf %333, %312 : vector<8x128xf32>
    %335 = arith.mulf %3, %334 : vector<8x128xf32>
    %c0_98 = arith.constant 0 : index
    %c30 = arith.constant 30 : index
    %336 = memref.load %arg2[%c0_98, %c30] : memref<2x32xf32, #tpu.memory_space<smem>>
    %337 = vector.broadcast %336 : f32 to vector<8x128xf32>
    %338 = arith.mulf %337, %335 : vector<8x128xf32>
    %339 = arith.addf %328, %338 : vector<8x128xf32>
    %c1_99 = arith.constant 1 : index
    %c30_100 = arith.constant 30 : index
    %340 = memref.load %arg2[%c1_99, %c30_100] : memref<2x32xf32, #tpu.memory_space<smem>>
    %341 = vector.broadcast %340 : f32 to vector<8x128xf32>
    %342 = arith.mulf %341, %335 : vector<8x128xf32>
    %343 = arith.addf %332, %342 : vector<8x128xf32>
    %344 = arith.mulf %12, %334 : vector<8x128xf32>
    %345 = arith.subf %344, %323 : vector<8x128xf32>
    %346 = arith.mulf %7, %345 : vector<8x128xf32>
    %c0_101 = arith.constant 0 : index
    %c31 = arith.constant 31 : index
    %347 = memref.load %arg2[%c0_101, %c31] : memref<2x32xf32, #tpu.memory_space<smem>>
    %348 = vector.broadcast %347 : f32 to vector<8x128xf32>
    %349 = arith.mulf %348, %346 : vector<8x128xf32>
    %350 = arith.addf %339, %349 : vector<8x128xf32>
    %c1_102 = arith.constant 1 : index
    %c31_103 = arith.constant 31 : index
    %351 = memref.load %arg2[%c1_102, %c31_103] : memref<2x32xf32, #tpu.memory_space<smem>>
    %352 = vector.broadcast %351 : f32 to vector<8x128xf32>
    %353 = arith.mulf %352, %346 : vector<8x128xf32>
    %354 = arith.addf %343, %353 : vector<8x128xf32>
    %c0_104 = arith.constant 0 : index
    %c0_105 = arith.constant 0 : index
    %c0_106 = arith.constant 0 : index
    %c0_107 = arith.constant 0 : index
    %355 = vector.load %arg3[%c0_104, %c0_105, %c0_106, %c0_107] : memref<2x1x8x128xf32, #tpu.memory_space<vmem>>, vector<1x1x8x128xf32>
    %356 = vector.shape_cast %355 : vector<1x1x8x128xf32> to vector<8x128xf32>
    %357 = vector.shape_cast %350 : vector<8x128xf32> to vector<1x1x8x128xf32>
    tpu.vector_store %arg3[%c0_104, %c0_105, %c0_106, %c0_107], %357 {strides = array<i32>} : memref<2x1x8x128xf32, #tpu.memory_space<vmem>>, vector<1x1x8x128xf32>,
    %c1_108 = arith.constant 1 : index
    %c0_109 = arith.constant 0 : index
    %c0_110 = arith.constant 0 : index
    %c0_111 = arith.constant 0 : index
    %358 = vector.load %arg3[%c1_108, %c0_109, %c0_110, %c0_111] : memref<2x1x8x128xf32, #tpu.memory_space<vmem>>, vector<1x1x8x128xf32>
    %359 = vector.shape_cast %358 : vector<1x1x8x128xf32> to vector<8x128xf32>
    %360 = vector.shape_cast %354 : vector<8x128xf32> to vector<1x1x8x128xf32>
    tpu.vector_store %arg3[%c1_108, %c0_109, %c0_110, %c0_111], %360 {strides = array<i32>} : memref<2x1x8x128xf32, #tpu.memory_space<vmem>>, vector<1x1x8x128xf32>,
    return
  }
  func.func @transform_0(%arg0: i32) -> (i32, i32, i32, i32) {
    %c0_i32 = arith.constant 0 : i32
    %c0_i32_0 = arith.constant 0 : i32
    %c0_i32_1 = arith.constant 0 : i32
    %c0_i32_2 = arith.constant 0 : i32
    return %c0_i32, %arg0, %c0_i32_0, %c0_i32_1 : i32, i32, i32, i32
  }
  func.func @transform_1(%arg0: i32) -> (i32, i32) {
    %c0_i32 = arith.constant 0 : i32
    %c0_i32_0 = arith.constant 0 : i32
    %c0_i32_1 = arith.constant 0 : i32
    return %c0_i32, %c0_i32_0 : i32, i32
  }
  func.func @transform_2(%arg0: i32) -> (i32, i32, i32, i32) {
    %c0_i32 = arith.constant 0 : i32
    %c0_i32_0 = arith.constant 0 : i32
    %c0_i32_1 = arith.constant 0 : i32
    %c0_i32_2 = arith.constant 0 : i32
    return %c0_i32, %arg0, %c0_i32_0, %c0_i32_1 : i32, i32, i32, i32
  }
}

</mosaic_0001>

<bundles_post_ra>
// kernel: tpu_custom_call.1
= control target key start
LH: loop header
LB: loop body
LE: loop exit
PB: predicated region body
PF: predicated region fallthrough
CT: control target
= control target key end

     0   :  { %7 = vsyncpa [#allocation3], 0  ;;  %s925_s0 = inlined_call_operand.hbm [shape: f32[2,1,8,128], index: 0, kind: input, shape index: {}]   ;;  %s926_s1 = inlined_call_operand.hbm [shape: f32[2,32], index: 1, kind: input, shape index: {}]   ;;  %s927_s2 = inlined_call_operand.hbm [shape: f32[2,1,8,128], index: 2, kind: output, shape index: {}]  }
   0x1   :  { %8 = vsyncpa [#allocation5], 0 }
   0x2   :  { %9 = vsyncpa [#allocation4], 0  ;;  %s14_s11 = sshll.u32 %s925_s0, 4  ;;  %s713_s12 = smov [#allocation2]   ;;  %s15_s11 = int_to_ptr.hbm [resolvable:$true] %s14_s11 }
   0x3   :  { %s16_s13 = sshll.u32 %s713_s12, 4  ;;  %s28_s16 = sshll.u32 %s926_s1, 4  ;;  %s17_s13 = int_to_ptr.vmem [resolvable:$true] %s16_s13  ;;  %s29_s16 = int_to_ptr.hbm [resolvable:$true] %s28_s16 }
   0x4   :  { %s714_s17 = smov 128   ;;  %s715_s18 = smov 8  }
   0x5   :  { %22 = dma.hbm_to_vmem [thread:$0]  %s15_s11, 256, %s17_s13, [#allocation3], %s714_s17, %s714_s17, %s715_s18  }
   0x6   :  { %s716_s19 = smov [#allocation6]  }
   0x7   :  { %31 = dma.hbm_to_smem %s29_s16, 32, %s716_s19, [#allocation5]  }
   0x8   :  { %707 = dma.done.wait [#allocation3], 256  }
   0x9   :  { %708 = vsyncadd [#allocation3], 4294967040 }
   0xa   :  { %709 = dma.done.wait [#allocation5], 32  }
   0xb   :  { %710 = vsyncadd [#allocation5], 4294967264 }
   0xc   :  { %40 = sfence }
   0xd   :  { %v749_v0 = vld [vmem:[#allocation2] sm:$0xff]  ;;  %v717_v12 = vmov 683565275   ;;  %v718_v14 = vmov 2475754826   ;;  %s572_s0 = sld [smem:[#allocation6 + $0x1]] }
   0xe   :  { %v53_v1 = vand.u32 2139095040, %v749_v0  ;;  %v50_v3 = vand.u32 2147483647, %v749_v0  ;;  %v719_v16 = vmov 2131351028   ;;  %vm52_vm12 = vcmp.lt.s32.totalorder %v749_v0, 0 }
   0xf   :  { %v720_v18 = vmov 2102212464   ;;  %v721_v20 = vmov 920167782   ;;  %v722_v26 = vmov 1326507024  }
  0x10   :  { %v54_v2 = vshrl.u32 %v53_v1, 23  ;;  %v57_v6 = vand.u32 8388607, %v50_v3  ;;  %v723_v1 = vmov 0   ;;  %vm793_vm13 = vcmp.le.f32.partialorder %v50_v3, 0.7853982 }
  0x11   :  { %s573_s1 = sld [smem:[#allocation6 + $0x81]] }
  0x12   :  { %v568_v4 = vadd.s32 4294967169, %v54_v2  ;;  %v58_v9 = vor.u32 8388608, %v57_v6  ;;  %s205_s20 = sld [smem:[#allocation6]] }
  0x13   :  { %s571_s21 = sld [smem:[#allocation6 + $0x80]] }
  0x14   :  { %v60_v5 = vadd.s32 1, %v568_v4  ;;  %v758_v28 = vshll.u32 %v58_v9, 8  ;;  %s575_s22 = sld [smem:[#allocation6 + $0x2]] }
  0x15   :  { %s576_s23 = sld [smem:[#allocation6 + $0x82]] }
  0x16   :  { %vm61_vm0 = vcmp.gt.s32.totalorder %v60_v5, 0  ;;  %v99_v40 = vand.u32 65535, %v758_v28  ;;  %v100_v41 = vshrl.u32 %v758_v28, 16  ;;  %s577_s24 = sld [smem:[#allocation6 + $0x3]] }
  0x17   :  { %v62_v7 = vsel %vm61_vm0, %v60_v5, 0  ;;  %s578_s25 = sld [smem:[#allocation6 + $0x83]] }
  0x18   :  { %v64_v8 = vand.u32 31, %v62_v7  ;;  %v755_v10 = vshrl.u32 %v62_v7, 5  ;;  %s811_s26 = sld [smem:[#allocation6 + $0x4]] }
  0x19   :  { %s580_s27 = sld [smem:[#allocation6 + $0x84]] }
  0x1a   :  { %v65_v11 = vsub.s32 32, %v64_v8  ;;  %v67_v13 = vshll.u32 %v717_v12, %v64_v8  ;;  %v70_v15 = vshll.u32 %v718_v14, %v64_v8  ;;  %v73_v17 = vshll.u32 %v719_v16, %v64_v8  ;;  %s817_s28 = sld [smem:[#allocation6 + $0x5]] }
  0x1b   :  { %v76_v19 = vshll.u32 %v720_v18, %v64_v8  ;;  %v79_v21 = vshll.u32 %v721_v20, %v64_v8  ;;  %vm82_vm1 = vcmp.lt.s32.totalorder %v755_v10, 1  ;;  %vm85_vm2 = vcmp.lt.s32.totalorder %v755_v10, 4  ;;  %s582_s29 = sld [smem:[#allocation6 + $0x85]] }
  0x1c   :  { %v68_v22 = vshrl.u32 %v718_v14, %v65_v11  ;;  %v71_v23 = vshrl.u32 %v719_v16, %v65_v11  ;;  %v74_v24 = vshrl.u32 %v720_v18, %v65_v11  ;;  %v77_v25 = vshrl.u32 %v721_v20, %v65_v11  ;;  %s826_s30 = sld [smem:[#allocation6 + $0x6]] }
  0x1d   :  { %v80_v27 = vshrl.u32 %v722_v26, %v65_v11  ;;  %vm84_vm3 = vcmp.lt.s32.totalorder %v755_v10, 3  ;;  %vm83_vm4 = vcmp.lt.s32.totalorder %v755_v10, 2  ;;  %v66_v48 = vshrl.u32 %v717_v12, %v65_v11  ;;  %s584_s3 = sld [smem:[#allocation6 + $0x86]] }
  0x1e   :  { %v69_v29 = vor.u32 %v68_v22, %v67_v13  ;;  %v72_v30 = vor.u32 %v71_v23, %v70_v15  ;;  %v75_v31 = vor.u32 %v74_v24, %v73_v17  ;;  %v78_v32 = vor.u32 %v77_v25, %v76_v19  ;;  %s835_s4 = sld [smem:[#allocation6 + $0x7]] }
  0x1f   :  { %v81_v33 = vor.u32 %v80_v27, %v79_v21  ;;  %s586_s5 = sld [smem:[#allocation6 + $0x87]] }
  0x20   :  { %v90_v34 = vsel %vm82_vm1, %v69_v29, %v72_v30  ;;  %v94_v35 = vsel %vm82_vm1, %v72_v30, %v75_v31  ;;  %v91_v36 = vsel %vm85_vm2, %v78_v32, 920167782  ;;  %v86_v61 = vsel %vm82_vm1, %v66_v48, %v69_v29  ;;  %s587_s6 = sld [smem:[#allocation6 + $0x8]] }
  0x21   :  { %v95_v37 = vsel %vm85_vm2, %v81_v33, 1326507024  ;;  %v92_v38 = vsel %vm84_vm3, %v75_v31, %v91_v36  ;;  %v87_v63 = vsel %vm85_vm2, %v75_v31, 2102212464  ;;  %vm193_vm1 = vweird.f32 %v749_v0  ;;  %s588_s7 = sld [smem:[#allocation6 + $0x88]] }
  0x22   :  { %v96_v39 = vsel %vm84_vm3, %v78_v32, %v95_v37  ;;  %v93_v42 = vsel %vm83_vm4, %v90_v34, %v92_v38  ;;  %v88_v12 = vsel %vm84_vm3, %v72_v30, %v87_v63  ;;  %s589_s8 = sld [smem:[#allocation6 + $0x9]] }
  0x23   :  { %v97_v43 = vsel %vm83_vm4, %v94_v35, %v96_v39  ;;  %v123_v46 = vand.u32 65535, %v93_v42  ;;  %v124_v47 = vshrl.u32 %v93_v42, 16  ;;  %v89_v20 = vsel %vm83_vm4, %v86_v61, %v88_v12  ;;  %s590_s9 = sld [smem:[#allocation6 + $0x89]] }
  0x24   :  { %v101_v44 = vand.u32 65535, %v97_v43  ;;  %v102_v45 = vshrl.u32 %v97_v43, 16  ;;  %v143_v24 = vmul.u32 %v758_v28, %v89_v20  ;;  %s591_s10 = sld [smem:[#allocation6 + $0xa]] }
  0x25   :  { %v125_v52 = vmul.u32 %v123_v46, %v99_v40  ;;  %v126_v53 = vmul.u32 %v124_v47, %v99_v40  ;;  %v127_v54 = vmul.u32 %v123_v46, %v100_v41  ;;  %v128_v58 = vmul.u32 %v124_v47, %v100_v41  ;;  %s592_s11 = sld [smem:[#allocation6 + $0x8a]] }
  0x26   :  { %v103_v49 = vmul.u32 %v101_v44, %v99_v40  ;;  %v104_v50 = vmul.u32 %v102_v45, %v99_v40  ;;  %v105_v51 = vmul.u32 %v101_v44, %v100_v41  ;;  %v106_v55 = vmul.u32 %v102_v45, %v100_v41  ;;  %s593_s12 = sld [smem:[#allocation6 + $0xb]] }
  0x27   :  { %v129_v59 = vshll.u32 %v126_v53, 16  ;;  %v131_v60 = vshll.u32 %v127_v54, 16  ;;  %v130_v9 = vshrl.u32 %v126_v53, 16  ;;  %v132_v16 = vshrl.u32 %v127_v54, 16  ;;  %s594_s13 = sld [smem:[#allocation6 + $0x8b]] }
  0x28   :  { %v107_v56 = vshll.u32 %v104_v50, 16  ;;  %v109_v57 = vshll.u32 %v105_v51, 16  ;;  %v108_v5 = vshrl.u32 %v104_v50, 16  ;;  %v110_v13 = vshrl.u32 %v105_v51, 16  ;;  %s595_s14 = sld [smem:[#allocation6 + $0xc]] }
  0x29   :  { %vm133_vm6 = vc.u32 %v125_v52, %v129_v59  ;;  %v135_v4 = vadd.s32 %v129_v59, %v125_v52  ;;  %s596_s15 = sld [smem:[#allocation6 + $0x8c]] }
  0x2a   :  { %vm111_vm5 = vc.u32 %v103_v49, %v107_v56  ;;  %v113_v62 = vadd.s32 %v107_v56, %v103_v49  ;;  %v134_v7 = vsel %vm133_vm6, 1, %v723_v1  ;;  %s597_s16 = sld [smem:[#allocation6 + $0xd]] }
  0x2b   :  { %v112_v2 = vsel %vm111_vm5, 1, %v723_v1  ;;  %v136_v11 = vadd.s32 %v134_v7, %v128_v58  ;;  %vm137_vm8 = vc.u32 %v135_v4, %v131_v60  ;;  %v139_v19 = vadd.s32 %v135_v4, %v131_v60  ;;  %s598_s19 = sld [smem:[#allocation6 + $0x8d]] }
  0x2c   :  { %v114_v6 = vadd.s32 %v112_v2, %v106_v55  ;;  %vm115_vm7 = vc.u32 %v113_v62, %v109_v57  ;;  %v138_v15 = vsel %vm137_vm8, 1, %v723_v1 }
  0x2d   :  { %v116_v8 = vsel %vm115_vm7, 1, %v723_v1  ;;  %v140_v17 = vadd.s32 %v138_v15, %v136_v11 }
  0x2e   :  { %v118_v14 = vadd.s32 %v116_v8, %v114_v6 }
  0x2f   :  { %v141_v21 = vadd.s32 %v140_v17, %v130_v9  ;;  %v808_v17 = vmul.f32 %v749_v0, %v749_v0 }
  0x30   :  { %v119_v18 = vadd.s32 %v118_v14, %v108_v5 }
  0x31   :  { %v142_v23 = vadd.s32 %v141_v21, %v132_v16  ;;  %v211_v16 = vstv %s572_s0  ;;  %s599_s0 = sld [smem:[#allocation6 + $0xe]] }
  0x32   :  { %v120_v22 = vadd.s32 %v119_v18, %v110_v13  ;;  %v215_v18 = vstv %s573_s1  ;;  %s600_s1 = sld [smem:[#allocation6 + $0x8e]] }
  0x33   :  { %v146_v25 = vadd.s32 1, %v142_v23 }
  0x34   :  { %vm145_vm9 = vc.u32 %v120_v22, %v139_v19  ;;  %v144_v10 = vadd.s32 %v139_v19, %v120_v22  ;;  %v206_v22 = vstv %s205_s20  ;;  %s866_s20 = sld [smem:[#allocation6 + $0xf]] }
  0x35   :  { %v147_v26 = vsel %vm145_vm9, %v146_v25, %v142_v23  ;;  %v208_v25 = vstv %s571_s21  ;;  %s602_s21 = sld [smem:[#allocation6 + $0x8f]] }
  0x36   :  { %v148_v27 = vadd.s32 %v147_v26, %v143_v24  ;;  %v222_v24 = vstv %s575_s22  ;;  %s603_s22 = sld [smem:[#allocation6 + $0x10]] }
  0x38   :  { %v149_v29 = vadd.s32 536870912, %v148_v27 }
  0x3a   :  { %v150_v30 = vshrl.u32 %v149_v29, 30 }
  0x3c   :  { %v151_v31 = vshll.u32 %v150_v30, 30  ;;  %v174_v51 = vsub.s32 4, %v150_v30 }
  0x3e   :  { %v152_v32 = vsub.s32 %v148_v27, %v151_v31  ;;  %v175_v56 = vsel %vm52_vm12, %v174_v51, %v150_v30  ;;  %v226_v27 = vstv %s576_s23  ;;  %v815_v30 = vld [vmem:[#allocation2 + $0x8] sm:$0xff]  ;;  %s604_s23 = sld [smem:[#allocation6 + $0x90]] }
  0x3f   :  { %v177_v59 = vsel %vm793_vm13, 0, %v175_v56 }
  0x40   :  { %vm153_vm10 = vcmp.lt.s32.totalorder %v152_v32, 0  ;;  %v154_v33 = vsub.s32 0, %v152_v32  ;;  %v194_v63 = vand.u32 3, %v177_v59 }
  0x42   :  { %v155_v34 = vsel %vm153_vm10, %v154_v33, %v152_v32  ;;  %vm199_vm14 = vcmp.eq.s32.totalorder %v194_v63, 2  ;;  %vm196_vm15 = vcmp.eq.s32.totalorder %v194_v63, 0  ;;  %vm195_vm0 = vcmp.lt.s32.totalorder %v194_v63, 2 }
  0x43   :  { %v156_v35 = vclz %v155_v34  ;;  %v266_v63 = vstv %s826_s30  ;;  %s611_s30 = sld [smem:[#allocation6 + $0x14]] }
  0x45   :  { %v569_v36 = vadd.s32 4294967294, %v156_v35 }
  0x47   :  { %vm570_vm11 = vcmp.lt.s32.totalorder %v569_v36, 0 }
  0x48   :  { %v159_v37 = vsel %vm570_vm11, 0, %v569_v36  ;;  %v233_v36 = vstv %s577_s24  ;;  %s872_s24 = sld [smem:[#allocation6 + $0x11]] }
  0x49   :  { %v160_v38 = vsub.s32 32, %v159_v37  ;;  %v161_v39 = vshll.u32 %v152_v32, %v159_v37  ;;  %v164_v40 = vsub.s32 4294967266, %v159_v37 }
  0x4b   :  { %v162_v28 = vshrl.u32 %v144_v10, %v160_v38  ;;  %v165_v41 = vadd.s32 127, %v164_v40  ;;  %v821_v10 = vmul.f32 %v815_v30, %v749_v0  ;;  %v237_v38 = vstv %s578_s25  ;;  %s606_s25 = sld [smem:[#allocation6 + $0x91]] }
  0x4d   :  { %v163_v42 = vor.u32 %v162_v28, %v161_v39  ;;  %v166_v43 = vshll.u32 %v165_v41, 23 }
  0x4f   :  { %v167_v44 = vor.u32 4788187, %v166_v43  ;;  %v170_v45 = vcvt.s32.f32 %v163_v42 }
  0x51   :  { %v168_v46 = vand.u32 2147483647, %v167_v44  ;;  %v244_v44 = vstv %s811_s26  ;;  %s877_s26 = sld [smem:[#allocation6 + $0x12]] }
  0x53   :  { %v171_v47 = vmul.f32 %v170_v45, %v168_v46  ;;  %v830_v45 = vmul.f32 %v808_v17, %v815_v30 }
  0x55   :  { %v172_v49 = vxor.u32 2147483648, %v171_v47 }
  0x57   :  { %v173_v50 = vsel %vm52_vm12, %v172_v49, %v171_v47  ;;  %v248_v47 = vstv %s580_s27  ;;  %s608_s27 = sld [smem:[#allocation6 + $0x92]] }
  0x58   :  { %v176_v52 = vsel %vm793_vm13, %v749_v0, %v173_v50 }
  0x59   :  { %v178_v53 = vmul.f32 %v176_v52, %v176_v52 }
  0x5b   :  { %v179_v54 = vmul.f32 -0.001358992, %v178_v53  ;;  %v186_v55 = vmul.f32 -0.00019511016, %v178_v53 }
  0x5d   :  { %v180_v57 = vadd.f32 0.041655596, %v179_v54  ;;  %v187_v58 = vadd.f32 0.008332121, %v186_v55  ;;  %v255_v54 = vstv %s817_s28  ;;  %v839_v55 = vmul.f32 %v815_v30, %v815_v30  ;;  %s609_s28 = sld [smem:[#allocation6 + $0x13]] }
  0x5f   :  { %v181_v3 = vmul.f32 %v180_v57, %v178_v53  ;;  %v188_v60 = vmul.f32 %v187_v58, %v178_v53  ;;  %v259_v57 = vstv %s582_s29  ;;  %s610_s29 = sld [smem:[#allocation6 + $0x93]] }
  0x61   :  { %v182_v61 = vadd.f32 -0.4999988, %v181_v3  ;;  %v189_v62 = vadd.f32 -0.16666654, %v188_v60 }
  0x63   :  { %v183_v1 = vmul.f32 %v182_v61, %v178_v53  ;;  %v190_v2 = vmul.f32 %v189_v62, %v178_v53 }
  0x65   :  { %v184_v4 = vadd.f32 1.0, %v183_v1  ;;  %v191_v5 = vadd.f32 1.0, %v190_v2  ;;  %v846_v1 = vmul.f32 %v839_v55, %v749_v0 }
  0x67   :  { %v192_v6 = vmul.f32 %v191_v5, %v176_v52  ;;  %v200_v7 = vxor.u32 2147483648, %v184_v4 }
  0x69   :  { %v197_v8 = vxor.u32 2147483648, %v192_v6  ;;  %v201_v9 = vsel %vm199_vm14, %v200_v7, %v192_v6 }
  0x6b   :  { %v198_v11 = vsel %vm196_vm15, %v184_v4, %v197_v8  ;;  %v270_v4 = vstv %s584_s3  ;;  %s612_s3 = sld [smem:[#allocation6 + $0x94]] }
  0x6c   :  { %v202_v12 = vsel %vm195_vm0, %v198_v11, %v201_v9 }
  0x6d   :  { %v203_v13 = vsel %vm193_vm1, nan, %v202_v12  ;;  %v277_v12 = vstv %s835_s4  ;;  %s613_s4 = sld [smem:[#allocation6 + $0x15]] }
  0x6e   :  { %v803_v14 = vadd.f32 %v203_v13, %v203_v13  ;;  %v209_v15 = vmul.f32 %v203_v13, %v749_v0 }
  0x70   :  { %v218_v19 = vmul.f32 %v803_v14, %v203_v13  ;;  %v212_v20 = vmul.f32 %v211_v16, %v209_v15  ;;  %v216_v23 = vmul.f32 %v215_v18, %v209_v15  ;;  %v281_v16 = vstv %s586_s5  ;;  %s614_s5 = sld [smem:[#allocation6 + $0x95]] }
  0x72   :  { %v574_v21 = vadd.f32 -1.0, %v218_v19  ;;  %v213_v31 = vadd.f32 %v212_v20, %v206_v22  ;;  %v217_v34 = vadd.f32 %v216_v23, %v208_v25 }
  0x74   :  { %v220_v26 = vmul.f32 %v574_v21, %v808_v17  ;;  %v229_v29 = vmul.f32 %v574_v21, %v803_v14 }
  0x76   :  { %v223_v32 = vmul.f32 %v222_v24, %v220_v26  ;;  %v230_v33 = vsub.f32 %v229_v29, %v203_v13  ;;  %v227_v35 = vmul.f32 %v226_v27, %v220_v26  ;;  %v853_v13 = vmul.f32 %v839_v55, %v808_v17 }
  0x77   :  { %v288_v24 = vstv %s587_s6  ;;  %v292_v26 = vstv %s588_s7  ;;  %s615_s6 = sld [smem:[#allocation6 + $0x16]] }
  0x78   :  { %v231_v37 = vmul.f32 %v230_v33, %v815_v30  ;;  %v240_v39 = vmul.f32 %v230_v33, %v803_v14  ;;  %v224_v40 = vadd.f32 %v223_v32, %v213_v31  ;;  %v228_v42 = vadd.f32 %v227_v35, %v217_v34  ;;  %s616_s7 = sld [smem:[#allocation6 + $0x96]] }
  0x79   :  { %v298_v35 = vstv %s589_s8  ;;  %s617_s8 = sld [smem:[#allocation6 + $0x17]] }
  0x7a   :  { %v234_v28 = vmul.f32 %v233_v36, %v231_v37  ;;  %v241_v41 = vsub.f32 %v240_v39, %v574_v21  ;;  %v238_v43 = vmul.f32 %v237_v38, %v231_v37  ;;  %v302_v36 = vstv %s590_s9  ;;  %s618_s9 = sld [smem:[#allocation6 + $0x97]] }
  0x7c   :  { %v242_v46 = vmul.f32 %v241_v41, %v821_v10  ;;  %v251_v48 = vmul.f32 %v241_v41, %v803_v14  ;;  %v235_v49 = vadd.f32 %v234_v28, %v224_v40  ;;  %v239_v52 = vadd.f32 %v238_v43, %v228_v42 }
  0x7d   :  { %v309_v42 = vstv %s591_s10  ;;  %v313_v43 = vstv %s592_s11  ;;  %s892_s10 = sld [smem:[#allocation6 + $0x18]] }
  0x7e   :  { %v245_v50 = vmul.f32 %v244_v44, %v242_v46  ;;  %v252_v51 = vsub.f32 %v251_v48, %v230_v33  ;;  %v249_v53 = vmul.f32 %v248_v47, %v242_v46  ;;  %s620_s11 = sld [smem:[#allocation6 + $0x98]] }
  0x80   :  { %v253_v56 = vmul.f32 %v252_v51, %v830_v45  ;;  %v262_v58 = vmul.f32 %v252_v51, %v803_v14  ;;  %v246_v59 = vadd.f32 %v245_v50, %v235_v49  ;;  %v250_v61 = vadd.f32 %v249_v53, %v239_v52 }
  0x81   :  { %v320_v52 = vstv %s593_s12  ;;  %v324_v53 = vstv %s594_s13  ;;  %s621_s12 = sld [smem:[#allocation6 + $0x19]] }
  0x82   :  { %v256_v3 = vmul.f32 %v255_v54, %v253_v56  ;;  %v263_v60 = vsub.f32 %v262_v58, %v241_v41  ;;  %v260_v62 = vmul.f32 %v259_v57, %v253_v56  ;;  %s622_s13 = sld [smem:[#allocation6 + $0x99]] }
  0x84   :  { %v264_v2 = vmul.f32 %v263_v60, %v839_v55  ;;  %v273_v5 = vmul.f32 %v263_v60, %v803_v14  ;;  %v257_v6 = vadd.f32 %v256_v3, %v246_v59  ;;  %v261_v9 = vadd.f32 %v260_v62, %v250_v61 }
  0x85   :  { %v331_v61 = vstv %s595_s14  ;;  %v335_v62 = vstv %s596_s15  ;;  %s898_s14 = sld [smem:[#allocation6 + $0x1a]] }
  0x86   :  { %v267_v7 = vmul.f32 %v266_v63, %v264_v2  ;;  %v274_v8 = vsub.f32 %v273_v5, %v252_v51  ;;  %v271_v11 = vmul.f32 %v270_v4, %v264_v2  ;;  %s624_s15 = sld [smem:[#allocation6 + $0x9a]] }
  0x88   :  { %v275_v15 = vmul.f32 %v274_v8, %v846_v1  ;;  %v284_v18 = vmul.f32 %v274_v8, %v803_v14  ;;  %v268_v19 = vadd.f32 %v267_v7, %v257_v6  ;;  %v272_v22 = vadd.f32 %v271_v11, %v261_v9 }
  0x89   :  { %v342_v9 = vstv %s597_s16  ;;  %v346_v11 = vstv %s598_s19  ;;  %s903_s16 = sld [smem:[#allocation6 + $0x1b]] }
  0x8a   :  { %v278_v20 = vmul.f32 %v277_v12, %v275_v15  ;;  %v285_v21 = vsub.f32 %v284_v18, %v263_v60  ;;  %v282_v23 = vmul.f32 %v281_v16, %v275_v15  ;;  %s626_s19 = sld [smem:[#allocation6 + $0x9b]] }
  0x8c   :  { %v286_v25 = vmul.f32 %v285_v21, %v853_v13  ;;  %v295_v27 = vmul.f32 %v285_v21, %v803_v14  ;;  %v279_v29 = vadd.f32 %v278_v20, %v268_v19  ;;  %v283_v33 = vadd.f32 %v282_v23, %v272_v22 }
  0x8d   :  { %v353_v22 = vstv %s599_s0  ;;  %v357_v23 = vstv %s600_s1  ;;  %s627_s0 = sld [smem:[#allocation6 + $0x1c]] }
  0x8e   :  { %v289_v31 = vmul.f32 %v288_v24, %v286_v25  ;;  %v296_v32 = vsub.f32 %v295_v27, %v274_v8  ;;  %v293_v34 = vmul.f32 %v292_v26, %v286_v25  ;;  %s628_s1 = sld [smem:[#allocation6 + $0x9c]] }
  0x90   :  { %v305_v37 = vmul.f32 %v296_v32, %v803_v14  ;;  %v290_v38 = vadd.f32 %v289_v31, %v279_v29  ;;  %v299_v39 = vmul.f32 %v298_v35, %v296_v32  ;;  %v294_v40 = vadd.f32 %v293_v34, %v283_v33 }
  0x91   :  { %v303_v28 = vmul.f32 %v302_v36, %v296_v32  ;;  %v364_v33 = vstv %s866_s20  ;;  %v368_v34 = vstv %s602_s21  ;;  %s629_s20 = sld [smem:[#allocation6 + $0x1d]] }
  0x92   :  { %v306_v41 = vsub.f32 %v305_v37, %v285_v21  ;;  %v300_v47 = vadd.f32 %v299_v39, %v290_v38  ;;  %s630_s21 = sld [smem:[#allocation6 + $0x9d]] }
  0x93   :  { %v304_v48 = vadd.f32 %v303_v28, %v294_v40 }
  0x94   :  { %v307_v44 = vmul.f32 %v306_v41, %v749_v0  ;;  %v316_v46 = vmul.f32 %v306_v41, %v803_v14 }
  0x96   :  { %v310_v49 = vmul.f32 %v309_v42, %v307_v44  ;;  %v314_v50 = vmul.f32 %v313_v43, %v307_v44  ;;  %v317_v51 = vsub.f32 %v316_v46, %v296_v32  ;;  %v379_v42 = vstv %s604_s23  ;;  %s632_s23 = sld [smem:[#allocation6 + $0x9e]] }
  0x98   :  { %v318_v54 = vmul.f32 %v317_v51, %v808_v17  ;;  %v327_v56 = vmul.f32 %v317_v51, %v803_v14  ;;  %v311_v57 = vadd.f32 %v310_v49, %v300_v47  ;;  %v315_v58 = vadd.f32 %v314_v50, %v304_v48 }
  0x9a   :  { %v321_v59 = vmul.f32 %v320_v52, %v318_v54  ;;  %v325_v3 = vmul.f32 %v324_v53, %v318_v54  ;;  %v328_v60 = vsub.f32 %v327_v56, %v306_v41  ;;  %v375_v41 = vstv %s603_s22  ;;  %s631_s22 = sld [smem:[#allocation6 + $0x1e]] }
  0x9b   :  { %v390_v52 = vstv %s606_s25  ;;  %s634_s25 = sld [smem:[#allocation6 + $0x9f]] }
  0x9c   :  { %v329_v63 = vmul.f32 %v328_v60, %v815_v30  ;;  %v338_v2 = vmul.f32 %v328_v60, %v803_v14  ;;  %v322_v4 = vadd.f32 %v321_v59, %v311_v57  ;;  %v326_v5 = vadd.f32 %v325_v3, %v315_v58 }
  0x9d   :  { %v396_v57 = vstv %s877_s26  ;;  %s724_s26 = smov [#allocation7]  }
  0x9e   :  { %v332_v6 = vmul.f32 %v331_v61, %v329_v63  ;;  %v336_v7 = vmul.f32 %v335_v62, %v329_v63  ;;  %v339_v8 = vsub.f32 %v338_v2, %v317_v51  ;;  %v386_v51 = vstv %s872_s24  ;;  %s633_s24 = sld [smem:[#allocation6 + $0x1f]] }
  0x9f   :  { %v400_v61 = vstv %s608_s27  ;;  %s552_s27 = sshll.u32 %s724_s26, 4  ;;  %s553_s27 = int_to_ptr.vmem [resolvable:$true] %s552_s27 }
  0xa0   :  { %v340_v12 = vmul.f32 %v339_v8, %v821_v10  ;;  %v349_v15 = vmul.f32 %v339_v8, %v803_v14  ;;  %v333_v16 = vadd.f32 %v332_v6, %v322_v4  ;;  %v337_v18 = vadd.f32 %v336_v7, %v326_v5 }
  0xa1   :  { %v407_v7 = vstv %s609_s28 }
  0xa2   :  { %v343_v19 = vmul.f32 %v342_v9, %v340_v12  ;;  %v347_v20 = vmul.f32 %v346_v11, %v340_v12  ;;  %v350_v21 = vsub.f32 %v349_v15, %v328_v60 }
  0xa4   :  { %v351_v24 = vmul.f32 %v350_v21, %v830_v45  ;;  %v360_v25 = vmul.f32 %v350_v21, %v803_v14  ;;  %v344_v26 = vadd.f32 %v343_v19, %v333_v16  ;;  %v348_v27 = vadd.f32 %v347_v20, %v337_v18 }
  0xa5   :  { %v418_v20 = vstv %s611_s30  ;;  %s554_s30 = sshll.u32 %s927_s2, 4  ;;  %s555_s30 = int_to_ptr.hbm [resolvable:$true] %s554_s30 }
  0xa6   :  { %v354_v29 = vmul.f32 %v353_v22, %v351_v24  ;;  %v358_v31 = vmul.f32 %v357_v23, %v351_v24  ;;  %v361_v32 = vsub.f32 %v360_v25, %v339_v8  ;;  %v411_v8 = vstv %s610_s29 }
  0xa8   :  { %v362_v35 = vmul.f32 %v361_v32, %v839_v55  ;;  %v371_v36 = vmul.f32 %v361_v32, %v803_v14  ;;  %v355_v37 = vadd.f32 %v354_v29, %v344_v26  ;;  %v359_v38 = vadd.f32 %v358_v31, %v348_v27 }
  0xa9   :  { %v429_v31 = vstv %s613_s4 }
  0xaa   :  { %v365_v39 = vmul.f32 %v364_v33, %v362_v35  ;;  %v369_v40 = vmul.f32 %v368_v34, %v362_v35  ;;  %v372_v28 = vsub.f32 %v371_v36, %v350_v21  ;;  %v422_v21 = vstv %s612_s3 }
  0xac   :  { %v373_v43 = vmul.f32 %v372_v28, %v846_v1  ;;  %v382_v44 = vmul.f32 %v372_v28, %v803_v14  ;;  %v366_v46 = vadd.f32 %v365_v39, %v355_v37  ;;  %v370_v47 = vadd.f32 %v369_v40, %v359_v38 }
  0xad   :  { %v440_v40 = vstv %s615_s6 }
  0xae   :  { %v376_v48 = vmul.f32 %v375_v41, %v373_v43  ;;  %v380_v49 = vmul.f32 %v379_v42, %v373_v43  ;;  %v383_v50 = vsub.f32 %v382_v44, %v361_v32  ;;  %v433_v32 = vstv %s614_s5 }
  0xb0   :  { %v384_v53 = vmul.f32 %v383_v50, %v853_v13  ;;  %v393_v54 = vmul.f32 %v383_v50, %v803_v14  ;;  %v377_v56 = vadd.f32 %v376_v48, %v366_v46  ;;  %v381_v58 = vadd.f32 %v380_v49, %v370_v47 }
  0xb1   :  { %v451_v49 = vstv %s617_s8 }
  0xb2   :  { %v387_v59 = vmul.f32 %v386_v51, %v384_v53  ;;  %v391_v3 = vmul.f32 %v390_v52, %v384_v53  ;;  %v394_v60 = vsub.f32 %v393_v54, %v372_v28  ;;  %v444_v28 = vstv %s616_s7 }
  0xb4   :  { %v388_v62 = vadd.f32 %v387_v59, %v377_v56  ;;  %v397_v63 = vmul.f32 %v396_v57, %v394_v60  ;;  %v403_v2 = vmul.f32 %v394_v60, %v803_v14  ;;  %v392_v4 = vadd.f32 %v391_v3, %v381_v58 }
  0xb5   :  { %v401_v5 = vmul.f32 %v400_v61, %v394_v60  ;;  %v462_v59 = vstv %s892_s10  ;;  %v466_v3 = vstv %s620_s11 }
  0xb6   :  { %v404_v6 = vsub.f32 %v403_v2, %v383_v50  ;;  %v398_v9 = vadd.f32 %v397_v63, %v388_v62  ;;  %v455_v50 = vstv %s618_s9 }
  0xb7   :  { %v402_v15 = vadd.f32 %v401_v5, %v392_v4  ;;  %v473_v5 = vstv %s621_s12 }
  0xb8   :  { %v405_v11 = vmul.f32 %v404_v6, %v749_v0  ;;  %v414_v12 = vmul.f32 %v404_v6, %v803_v14 }
  0xba   :  { %v408_v16 = vmul.f32 %v407_v7, %v405_v11  ;;  %v412_v18 = vmul.f32 %v411_v8, %v405_v11  ;;  %v415_v19 = vsub.f32 %v414_v12, %v394_v60 }
  0xbc   :  { %v409_v22 = vadd.f32 %v408_v16, %v398_v9  ;;  %v416_v23 = vmul.f32 %v415_v19, %v808_v17  ;;  %v425_v24 = vmul.f32 %v415_v19, %v803_v14  ;;  %v413_v25 = vadd.f32 %v412_v18, %v402_v15 }
  0xbd   :  { %v484_v16 = vstv %s898_s14  ;;  %v488_v18 = vstv %s624_s15 }
  0xbe   :  { %v419_v26 = vmul.f32 %v418_v20, %v416_v23  ;;  %v423_v27 = vmul.f32 %v422_v21, %v416_v23  ;;  %v426_v29 = vsub.f32 %v425_v24, %v404_v6  ;;  %v477_v6 = vstv %s622_s13 }
  0xbf   :  { %v494_v23 = vstv %s903_s16 }
  0xc0   :  { %v420_v33 = vadd.f32 %v419_v26, %v409_v22  ;;  %v427_v34 = vmul.f32 %v426_v29, %v815_v30  ;;  %v436_v35 = vmul.f32 %v426_v29, %v803_v14  ;;  %v424_v36 = vadd.f32 %v423_v27, %v413_v25 }
  0xc1   :  { %v498_v26 = vstv %s626_s19 }
  0xc2   :  { %v430_v37 = vmul.f32 %v429_v31, %v427_v34  ;;  %v434_v38 = vmul.f32 %v433_v32, %v427_v34  ;;  %v437_v39 = vsub.f32 %v436_v35, %v415_v19  ;;  %v509_v35 = vstv %s628_s1 }
  0xc4   :  { %v431_v41 = vadd.f32 %v430_v37, %v420_v33  ;;  %v438_v42 = vmul.f32 %v437_v39, %v821_v10  ;;  %v447_v43 = vmul.f32 %v437_v39, %v803_v14  ;;  %v435_v44 = vadd.f32 %v434_v38, %v424_v36 }
  0xc6   :  { %v441_v46 = vmul.f32 %v440_v40, %v438_v42  ;;  %v445_v47 = vmul.f32 %v444_v28, %v438_v42  ;;  %v448_v48 = vsub.f32 %v447_v43, %v426_v29  ;;  %v516_v42 = vstv %s629_s20 }
  0xc7   :  { %v520_v43 = vstv %s630_s21 }
  0xc8   :  { %v442_v51 = vadd.f32 %v441_v46, %v431_v41  ;;  %v449_v52 = vmul.f32 %v448_v48, %v830_v45  ;;  %v458_v53 = vmul.f32 %v448_v48, %v803_v14  ;;  %v446_v54 = vadd.f32 %v445_v47, %v435_v44 }
  0xca   :  { %v452_v56 = vmul.f32 %v451_v49, %v449_v52  ;;  %v456_v57 = vmul.f32 %v455_v50, %v449_v52  ;;  %v459_v58 = vsub.f32 %v458_v53, %v437_v39  ;;  %v527_v52 = vstv %s631_s22 }
  0xcc   :  { %v453_v60 = vadd.f32 %v452_v56, %v442_v51  ;;  %v460_v61 = vmul.f32 %v459_v58, %v839_v55  ;;  %v469_v62 = vmul.f32 %v459_v58, %v803_v14  ;;  %v457_v63 = vadd.f32 %v456_v57, %v446_v54 }
  0xce   :  { %v463_v45 = vmul.f32 %v462_v59, %v460_v61  ;;  %v467_v2 = vmul.f32 %v466_v3, %v460_v61  ;;  %v470_v4 = vsub.f32 %v469_v62, %v448_v48  ;;  %v542_v61 = vstv %s634_s25 }
  0xd0   :  { %v464_v7 = vadd.f32 %v463_v45, %v453_v60  ;;  %v471_v8 = vmul.f32 %v470_v4, %v846_v1  ;;  %v480_v9 = vmul.f32 %v470_v4, %v803_v14  ;;  %v468_v11 = vadd.f32 %v467_v2, %v457_v63 }
  0xd1   :  { %v538_v60 = vstv %s633_s24 }
  0xd2   :  { %v474_v55 = vmul.f32 %v473_v5, %v471_v8  ;;  %v478_v12 = vmul.f32 %v477_v6, %v471_v8  ;;  %v481_v15 = vsub.f32 %v480_v9, %v459_v58 }
  0xd4   :  { %v475_v19 = vadd.f32 %v474_v55, %v464_v7  ;;  %v482_v20 = vmul.f32 %v481_v15, %v853_v13  ;;  %v491_v21 = vmul.f32 %v481_v15, %v803_v14  ;;  %v479_v22 = vadd.f32 %v478_v12, %v468_v11 }
  0xd5   :  { %v505_v13 = vstv %s627_s0 }
  0xd6   :  { %v485_v24 = vmul.f32 %v484_v16, %v482_v20  ;;  %v489_v25 = vmul.f32 %v488_v18, %v482_v20  ;;  %v492_v1 = vsub.f32 %v491_v21, %v470_v4 }
  0xd8   :  { %v486_v27 = vadd.f32 %v485_v24, %v475_v19  ;;  %v490_v29 = vadd.f32 %v489_v25, %v479_v22  ;;  %v495_v31 = vmul.f32 %v494_v23, %v492_v1  ;;  %v499_v32 = vmul.f32 %v498_v26, %v492_v1 }
  0xd9   :  { %v501_v33 = vmul.f32 %v492_v1, %v803_v14 }
  0xda   :  { %v496_v36 = vadd.f32 %v495_v31, %v486_v27  ;;  %v500_v37 = vadd.f32 %v499_v32, %v490_v29 }
  0xdb   :  { %v502_v34 = vsub.f32 %v501_v33, %v481_v15 }
  0xdd   :  { %v503_v38 = vmul.f32 %v502_v34, %v749_v0  ;;  %v512_v39 = vmul.f32 %v502_v34, %v803_v14  ;;  %v531_v0 = vstv %s632_s23 }
  0xdf   :  { %v506_v40 = vmul.f32 %v505_v13, %v503_v38  ;;  %v510_v28 = vmul.f32 %v509_v35, %v503_v38  ;;  %v513_v41 = vsub.f32 %v512_v39, %v492_v1 }
  0xe1   :  { %v507_v44 = vadd.f32 %v506_v40, %v496_v36  ;;  %v511_v46 = vadd.f32 %v510_v28, %v500_v37  ;;  %v514_v47 = vmul.f32 %v513_v41, %v808_v17  ;;  %v523_v48 = vmul.f32 %v513_v41, %v803_v14 }
  0xe3   :  { %v517_v49 = vmul.f32 %v516_v42, %v514_v47  ;;  %v521_v50 = vmul.f32 %v520_v43, %v514_v47  ;;  %v524_v51 = vsub.f32 %v523_v48, %v502_v34 }
  0xe5   :  { %v518_v53 = vadd.f32 %v517_v49, %v507_v44  ;;  %v522_v54 = vadd.f32 %v521_v50, %v511_v46  ;;  %v525_v56 = vmul.f32 %v524_v51, %v815_v30  ;;  %v534_v57 = vmul.f32 %v524_v51, %v803_v14 }
  0xe7   :  { %v528_v58 = vmul.f32 %v527_v52, %v525_v56  ;;  %v532_v59 = vmul.f32 %v531_v0, %v525_v56  ;;  %v535_v3 = vsub.f32 %v534_v57, %v513_v41 }
  0xe9   :  { %v529_v62 = vadd.f32 %v528_v58, %v518_v53  ;;  %v533_v17 = vadd.f32 %v532_v59, %v522_v54  ;;  %v536_v63 = vmul.f32 %v535_v3, %v821_v10 }
  0xeb   :  { %v539_v45 = vmul.f32 %v538_v60, %v536_v63  ;;  %v543_v2 = vmul.f32 %v542_v61, %v536_v63 }
  0xed   :  { %v540_v30 = vadd.f32 %v539_v45, %v529_v62  ;;  %v544_v4 = vadd.f32 %v543_v2, %v533_v17 }
  0xef   :  { %545 = vst [vmem:[#allocation7] sm:$0xff] %v540_v30 }
  0xf0   :  { %547 = vst [vmem:[#allocation7 + $0x8] sm:$0xff] %v544_v4 }
  0xf1   :  { %560 = dma.vmem_to_hbm [thread:$0]  %s553_s27, 256, %s555_s30, [#allocation4], %s714_s17, %s714_s17, %s715_s18  }
  0xf2   :  { %711 = dma.done.wait [#allocation4], 256  }
  0xf3   :  { %712 = vsyncadd [#allocation4], 4294967040 }
  0xf4   :  { %565 = vsyncpa [#allocation3], 1 }
  0xf5   :  { %566 = vsyncpa [#allocation4], 1 }
  0xf6   :  { %567 = vsyncpa [#allocation5], 1 }

</bundles_post_ra>
